<compile_context>
chip_gen: v6e
topology: v6e:2x2x1
jax: 0.10.0
libtpu: 0.0.40
codegen_flags: <defaults>
</compile_context>

<pallas_src>
import jax
import jax.numpy as jnp
from jax import lax
from jax.experimental import pallas as pl
from jax.experimental.pallas import tpu as pltpu

_LANES = 128
_SUBL = 8
_MAX_BLOCK_ROWS = 1024   # 1024 x 128 f32 = 512 KiB per stream per buffer


def _cdiv(a, b):
    return -(-a // b)


def _prep(x):
    """Flatten to 1D; pad (only if needed) to a 128 multiple; view as (R,128)."""
    flat = jnp.ravel(x)
    n = flat.shape[0]
    r_total = _cdiv(n, _LANES)
    pad = r_total * _LANES - n
    if pad:
        flat = jnp.pad(flat, (0, pad))   # zero pad -> contributes 0 to sums
    return flat.reshape(r_total, _LANES), n, r_total


def _pick_block_rows(r_total):
    """Largest useful block row count, multiple of 8, capped for VMEM."""
    return min(_MAX_BLOCK_ROWS, _cdiv(r_total, _SUBL) * _SUBL)


# --------------------------- reduction ('mean'/'sum') -----------------------

def _run_reduce(p2, t2, w2, block_rows):
    """Returns (sum_sq, sum_w) as scalars; sum_w is None when w2 is None."""
    r_total = p2.shape[0]
    n_blocks = _cdiv(r_total, block_rows)
    nc = 2 if n_blocks >= 2 else 1           # shard reduction over TensorCores
    bpc = _cdiv(n_blocks, nc)                # blocks per core
    needs_mask = (nc * bpc * block_rows) != r_total
    weighted = w2 is not None
    fold = block_rows // _SUBL

    def _mask(c, i):
        rows = lax.broadcasted_iota(jnp.int32, (block_rows, _LANES), 0)
        grow = (c * bpc + i) * block_rows + rows
        return grow < r_total

    def _fold(x):
        # (block_rows, 128) -> (8, 128) partial sums; pure vreg adds, no XLU.
        return x.reshape(fold, _SUBL, _LANES).sum(axis=0)

    if weighted:
        def kern(p_ref, t_ref, w_ref, osq_ref, ow_ref):
            c = pl.program_id(0)
            i = pl.program_id(1)

            @pl.when(i == 0)
            def _():
                osq_ref[...] = jnp.zeros_like(osq_ref)
                ow_ref[...] = jnp.zeros_like(ow_ref)

            d = p_ref[...].astype(jnp.float32) - t_ref[...].astype(jnp.float32)
            w = w_ref[...].astype(jnp.float32)
            sq = d * d
            if needs_mask:
                m = _mask(c, i)
                w = jnp.where(m, w, 0.0)
                sq = jnp.where(m, sq, 0.0)
            osq_ref[...] += _fold(sq * w)
            ow_ref[...] += _fold(w)

        inputs = (p2, t2, w2)
        out_shape = (jax.ShapeDtypeStruct((nc * _SUBL, _LANES), jnp.float32),
                     jax.ShapeDtypeStruct((nc * _SUBL, _LANES), jnp.float32))
        out_specs = (pl.BlockSpec((_SUBL, _LANES), lambda c, i: (c, 0)),
                     pl.BlockSpec((_SUBL, _LANES), lambda c, i: (c, 0)))
    else:
        def kern(p_ref, t_ref, osq_ref):
            c = pl.program_id(0)
            i = pl.program_id(1)

            @pl.when(i == 0)
            def _():
                osq_ref[...] = jnp.zeros_like(osq_ref)

            d = p_ref[...].astype(jnp.float32) - t_ref[...].astype(jnp.float32)
            sq = d * d
            if needs_mask:
                sq = jnp.where(_mask(c, i), sq, 0.0)
            osq_ref[...] += _fold(sq)

        inputs = (p2, t2)
        out_shape = jax.ShapeDtypeStruct((nc * _SUBL, _LANES), jnp.float32)
        out_specs = pl.BlockSpec((_SUBL, _LANES), lambda c, i: (c, 0))

    # Clamp block index so over-coverage blocks stay in-bounds; their
    # contribution is zeroed by the mask.
    in_spec = pl.BlockSpec(
        (block_rows, _LANES),
        lambda c, i: (jnp.minimum(c * bpc + i, n_blocks - 1), 0))

    out = pl.pallas_call(
        kern,
        out_shape=out_shape,
        grid_spec=pltpu.PrefetchScalarGridSpec(
            num_scalar_prefetch=0,
            grid=(nc, bpc),
            in_specs=[in_spec] * len(inputs),
            out_specs=out_specs,
        ),
        compiler_params=pltpu.CompilerParams(
            dimension_semantics=("parallel", "arbitrary")),
    )(*inputs)

    if weighted:
        return jnp.sum(out[0]), jnp.sum(out[1])
    return jnp.sum(out), None


# --------------------------- elementwise ('none') ---------------------------

def _run_elementwise(p2, t2, w2, block_rows, loss_weight, out_dtype):
    r_total = p2.shape[0]
    n_blocks = _cdiv(r_total, block_rows)
    lw = float(loss_weight)

    def _finish(val, o_ref):
        if lw != 1.0:
            val = val * jnp.float32(lw)
        o_ref[...] = val.astype(o_ref.dtype)

    if w2 is None:
        def kern(p_ref, t_ref, o_ref):
            d = p_ref[...].astype(jnp.float32) - t_ref[...].astype(jnp.float32)
            _finish(d * d, o_ref)
        inputs = (p2, t2)
    else:
        def kern(p_ref, t_ref, w_ref, o_ref):
            d = p_ref[...].astype(jnp.float32) - t_ref[...].astype(jnp.float32)
            _finish(d * d * w_ref[...].astype(jnp.float32), o_ref)
        inputs = (p2, t2, w2)

    spec = pl.BlockSpec((block_rows, _LANES), lambda i: (i, 0))
    return pl.pallas_call(
        kern,
        out_shape=jax.ShapeDtypeStruct((r_total, _LANES), out_dtype),
        grid_spec=pltpu.PrefetchScalarGridSpec(
            num_scalar_prefetch=0,
            grid=(n_blocks,),
            in_specs=[spec] * len(inputs),
            out_specs=spec,
        ),
        compiler_params=pltpu.CompilerParams(
            dimension_semantics=("parallel",)),
    )(*inputs)


# --------------------------------- wrapper ----------------------------------

def mse_loss_pallas(pred, target, weight=None, loss_weight=1.0,
                    reduction="mean"):
    """Equivalent of basicsr MSELoss(loss_weight, reduction)(pred, target, weight)."""
    if reduction not in ("none", "mean", "sum"):
        raise ValueError(f"Unsupported reduction mode: {reduction}")

    orig_shape = pred.shape
    p2, n, r_total = _prep(pred)
    t2, _, _ = _prep(target)

    w2 = None
    if weight is not None:
        # basicsr broadcasts a C==1 weight to the full loss shape; the weighted
        # mean denominator is sum(broadcast weight), matching this.
        # TODO(synk): stream the un-broadcast weight via index_map for the C==1
        # case instead of materializing the broadcast.
        w_full = weight if weight.shape == orig_shape else jnp.broadcast_to(
            weight, orig_shape)
        w2, _, _ = _prep(w_full)

    block_rows = _pick_block_rows(r_total)

    if reduction == "none":
        out2 = _run_elementwise(p2, t2, w2, block_rows, loss_weight, pred.dtype)
        return out2.reshape(-1)[:n].reshape(orig_shape)

    sum_sq, sum_w = _run_reduce(p2, t2, w2, block_rows)
    if reduction == "sum":
        loss = sum_sq
    elif weight is None:
        loss = sum_sq / jnp.float32(n)
    else:
        loss = sum_sq / sum_w            # basicsr: loss.sum() / weight.sum()
    return (jnp.float32(loss_weight) * loss).astype(jnp.float32)


if __name__ == "__main__":
    key = jax.random.PRNGKey(0)
    k1, k2, k3 = jax.random.split(key, 3)
    shape = (2, 4, 16, 16)  # (N, C, H, W)

    pred = jax.random.normal(k1, shape, dtype=jnp.float32)
    target = jax.random.normal(k2, shape, dtype=jnp.float32)
    weight = jax.random.uniform(k3, shape, dtype=jnp.float32)

    sq = (pred - target) ** 2

    # reduction='mean', no weight
    out_mean = jax.block_until_ready(
        mse_loss_pallas(pred, target, reduction="mean"))
    ref_mean = jnp.mean(sq)
    assert jnp.allclose(out_mean, ref_mean, rtol=1e-5, atol=1e-5)

    # reduction='sum', no weight
    out_sum = jax.block_until_ready(
        mse_loss_pallas(pred, target, reduction="sum"))
    ref_sum = jnp.sum(sq)
    assert jnp.allclose(out_sum, ref_sum, rtol=1e-4, atol=1e-3)

    # reduction='none', with elementwise weight
    out_none = jax.block_until_ready(
        mse_loss_pallas(pred, target, weight=weight, reduction="none"))
    ref_none = sq * weight
    assert out_none.shape == shape
    assert out_none.dtype == pred.dtype
    assert jnp.allclose(out_none, ref_none, rtol=1e-5, atol=1e-5)

    # reduction='none', no weight, loss_weight fused
    out_none_nw = jax.block_until_ready(
        mse_loss_pallas(pred, target, loss_weight=2.0, reduction="none"))
    assert jnp.allclose(out_none_nw, 2.0 * sq, rtol=1e-5, atol=1e-5)

    # reduction='mean', with weight (basicsr weighted mean), loss_weight=0.5
    out_wmean = jax.block_until_ready(
        mse_loss_pallas(pred, target, weight=weight, loss_weight=0.5,
                        reduction="mean"))
    ref_wmean = 0.5 * jnp.sum(sq * weight) / jnp.sum(weight)
    assert jnp.allclose(out_wmean, ref_wmean, rtol=1e-5, atol=1e-5)

    print("KERNEL_OK")
</pallas_src>

<mosaic_0001>
module attributes {stable_mosaic.version = 11 : i64} {
  func.func @kern(%arg0: i32, %arg1: i32, %arg2: memref<16x128xf32, #tpu.memory_space<vmem>>, %arg3: memref<16x128xf32, #tpu.memory_space<vmem>>, %arg4: memref<8x128xf32, #tpu.memory_space<vmem>>) attributes {dimension_semantics = [#tpu.dimension_semantics<parallel>, #tpu.dimension_semantics<arbitrary>], iteration_bounds = array<i64: 1, 1>, scalar_prefetch = 0 : i64, scratch_operands = 0 : i64, tpu.core_type = #tpu.core_type<tc>, window_params = [{transform_indices = @transform_0, window_bounds = array<i64: 16, 128>}, {transform_indices = @transform_1, window_bounds = array<i64: 16, 128>}, {transform_indices = @transform_2, window_bounds = array<i64: 8, 128>}]} {
    %c0_i32 = arith.constant 0 : i32
    %0 = arith.cmpi eq, %arg1, %c0_i32 : i32
    %1 = arith.extui %0 : i1 to i32
    %c0_i32_0 = arith.constant 0 : i32
    %2 = arith.cmpi ne, %1, %c0_i32_0 : i32
    scf.if %2 {
      %cst_8 = arith.constant 0.000000e+00 : f32
      %12 = vector.broadcast %cst_8 : f32 to vector<8x128xf32>
      %c0_9 = arith.constant 0 : index
      %c0_10 = arith.constant 0 : index
      %13 = vector.load %arg4[%c0_9, %c0_10] : memref<8x128xf32, #tpu.memory_space<vmem>>, vector<8x128xf32>
      tpu.vector_store %arg4[%c0_9, %c0_10], %12 {strides = array<i32>} : memref<8x128xf32, #tpu.memory_space<vmem>>, vector<8x128xf32>,
    } else {
    }
    %c0 = arith.constant 0 : index
    %c0_1 = arith.constant 0 : index
    %3 = vector.load %arg2[%c0, %c0_1] : memref<16x128xf32, #tpu.memory_space<vmem>>, vector<16x128xf32>
    %c0_2 = arith.constant 0 : index
    %c0_3 = arith.constant 0 : index
    %4 = vector.load %arg3[%c0_2, %c0_3] : memref<16x128xf32, #tpu.memory_space<vmem>>, vector<16x128xf32>
    %5 = arith.subf %3, %4 : vector<16x128xf32>
    %6 = arith.mulf %5, %5 : vector<16x128xf32>
    %c0_4 = arith.constant 0 : index
    %c0_5 = arith.constant 0 : index
    %7 = vector.load %arg4[%c0_4, %c0_5] : memref<8x128xf32, #tpu.memory_space<vmem>>, vector<8x128xf32>
    %8 = vector.shape_cast %6 : vector<16x128xf32> to vector<2x8x128xf32>
    %cst = arith.constant dense<0.000000e+00> : vector<8x128xf32>
    %9 = vector.multi_reduction <add>, %8, %cst [0] : vector<2x8x128xf32> to vector<8x128xf32>
    %10 = arith.addf %7, %9 : vector<8x128xf32>
    %c0_6 = arith.constant 0 : index
    %c0_7 = arith.constant 0 : index
    %11 = vector.load %arg4[%c0_6, %c0_7] : memref<8x128xf32, #tpu.memory_space<vmem>>, vector<8x128xf32>
    tpu.vector_store %arg4[%c0_6, %c0_7], %10 {strides = array<i32>} : memref<8x128xf32, #tpu.memory_space<vmem>>, vector<8x128xf32>,
    return
  }
  func.func @transform_0(%arg0: i32, %arg1: i32) -> (i32, i32) {
    %c1_i32 = arith.constant 1 : i32
    %0 = arith.muli %arg0, %c1_i32 : i32
    %1 = arith.addi %0, %arg1 : i32
    %c0_i32 = arith.constant 0 : i32
    %2 = arith.minsi %1, %c0_i32 : i32
    %c0_i32_0 = arith.constant 0 : i32
    %c0_i32_1 = arith.constant 0 : i32
    return %2, %c0_i32_0 : i32, i32
  }
  func.func @transform_1(%arg0: i32, %arg1: i32) -> (i32, i32) {
    %c1_i32 = arith.constant 1 : i32
    %0 = arith.muli %arg0, %c1_i32 : i32
    %1 = arith.addi %0, %arg1 : i32
    %c0_i32 = arith.constant 0 : i32
    %2 = arith.minsi %1, %c0_i32 : i32
    %c0_i32_0 = arith.constant 0 : i32
    %c0_i32_1 = arith.constant 0 : i32
    return %2, %c0_i32_0 : i32, i32
  }
  func.func @transform_2(%arg0: i32, %arg1: i32) -> (i32, i32) {
    %c0_i32 = arith.constant 0 : i32
    %c0_i32_0 = arith.constant 0 : i32
    return %arg0, %c0_i32 : i32, i32
  }
}

</mosaic_0001>

<bundles_post_ra>
// kernel: tpu_custom_call.1
= control target key start
LH: loop header
LB: loop body
LE: loop exit
PB: predicated region body
PF: predicated region fallthrough
CT: control target
= control target key end

     0   :  { %7 = vsyncpa [#allocation3], 0  ;;  %s198_s0 = inlined_call_operand.hbm [shape: f32[16,128], index: 0, kind: input, shape index: {}]   ;;  %s199_s1 = inlined_call_operand.hbm [shape: f32[16,128], index: 1, kind: input, shape index: {}]   ;;  %s200_s2 = inlined_call_operand.hbm [shape: f32[8,128], index: 2, kind: output, shape index: {}]  }
   0x1   :  { %8 = vsyncpa [#allocation6], 0 }
   0x2   :  { %9 = vsyncpa [#allocation4], 0  ;;  %s169_s9 = smov [#allocation2]  }
   0x3   :  { %s21_s10 = sshll.u32 %s169_s9, 4  ;;  %s22_s10 = int_to_ptr.vmem [resolvable:$true] %s21_s10 }
   0x4   :  { %s111_s11 = scalar_lea.vmem %s22_s10, 256  ;;  %p116_p1 = scmp.lt.s32.totalorder %s22_s10, %s22_s10 }
   0x5   :  { %p112_p0 = scmp.ne.s32.totalorder %s22_s10, %s111_s11  ;;  %p117_p2 = scmp.lt.s32.totalorder %s111_s11, %s111_s11 }
   0x7   :  { %p118_p3 = por %p117_p2, %p116_p1 }
   0x9   :  { %p119_p4 = pnand %p118_p3, %p112_p0 }
   0xb   :  { %122 = shalt.err (!%p119_p4)
}
   0xc   :  { %s170_s12 = smov 128   ;;  %s171_s13 = smov 8  }
   0xd   :  { %27 = dma.hbm_to_vmem [thread:$0]  %s198_s0, 256, %s22_s10, [#allocation3], %s170_s12, %s170_s12, %s171_s13  }
   0xe   :  { %s172_s16 = smov [#allocation5]  }
   0xf   :  { %s39_s17 = sshll.u32 %s172_s16, 4  ;;  %s40_s17 = int_to_ptr.vmem [resolvable:$true] %s39_s17 }
  0x10   :  { %s131_s18 = scalar_lea.vmem %s40_s17, 256  ;;  %p136_p6 = scmp.lt.s32.totalorder %s40_s17, %s40_s17 }
  0x11   :  { %p132_p5 = scmp.ne.s32.totalorder %s40_s17, %s131_s18  ;;  %p137_p7 = scmp.lt.s32.totalorder %s131_s18, %s131_s18 }
  0x13   :  { %p138_p8 = por %p137_p7, %p136_p6 }
  0x15   :  { %p139_p9 = pnand %p138_p8, %p132_p5 }
  0x17   :  { %142 = shalt.err (!%p139_p9)
}
  0x18   :  { %45 = dma.hbm_to_vmem [thread:$0]  %s199_s1, 256, %s40_s17, [#allocation6], %s170_s12, %s170_s12, %s171_s13  }
  0x19   :  { %163 = dma.done.wait [#allocation3], 256  }
  0x1a   :  { %164 = vsyncadd [#allocation3], 4294967040 }
  0x1b   :  { %165 = dma.done.wait [#allocation6], 256  }
  0x1c   :  { %166 = vsyncadd [#allocation6], 4294967040  ;;  %v65_v0 = vld [vmem:[#allocation2] sm:$0xff]  ;;  %v66_v1 = vld [vmem:[#allocation2 + $0x8] sm:$0xff]  ;;  %s173_s0 = smov [#allocation7]  }
  0x1d   :  { %v67_v2 = vld [vmem:[#allocation5] sm:$0xff]  ;;  %v68_v3 = vld [vmem:[#allocation5 + $0x8] sm:$0xff]  ;;  %s83_s21 = sshll.u32 %s173_s0, 4  ;;  %s84_s21 = int_to_ptr.vmem [resolvable:$true] %s83_s21 }
  0x1e   :  { %v69_v4 = vsub.f32 %v65_v0, %v67_v2  ;;  %v70_v5 = vsub.f32 %v66_v1, %v68_v3  ;;  %s143_s22 = scalar_lea.vmem %s84_s21, 128  ;;  %p148_p11 = scmp.lt.s32.totalorder %s84_s21, %s84_s21 }
  0x1f   :  { %p144_p10 = scmp.ne.s32.totalorder %s84_s21, %s143_s22  ;;  %p149_p12 = scmp.lt.s32.totalorder %s143_s22, %s143_s22 }
  0x20   :  { %v71_v6 = vmul.f32 %v69_v4, %v69_v4  ;;  %v72_v7 = vmul.f32 %v70_v5, %v70_v5 }
  0x21   :  { %p150_p13 = por %p149_p12, %p148_p11 }
  0x22   :  { %v74_v8 = vadd.f32 %v72_v7, %v71_v6 }
  0x23   :  { %p151_p0 = pnand %p150_p13, %p144_p10 }
  0x24   :  { %76 = vst [vmem:[#allocation7] sm:$0xff] %v74_v8 }
  0x25   :  { %154 = shalt.err (!%p151_p0)
}
  0x26   :  { %86 = dma.vmem_to_hbm [thread:$0]  %s84_s21, 128, %s200_s2, [#allocation4]  }
  0x27   :  { %167 = dma.done.wait [#allocation4], 128  }
  0x28   :  { %168 = vsyncadd [#allocation4], 4294967168 }
  0x29   :  { %90 = vsyncpa [#allocation3], 1 }
  0x2a   :  { %91 = vsyncpa [#allocation6], 1 }
  0x2b   :  { %92 = vsyncpa [#allocation4], 1 }

</bundles_post_ra>
